<compile_context>
chip_gen: v7x
topology: tpu7x:2x2x1
jax: 0.10.0
libtpu: 0.0.40
codegen_flags: <defaults>
</compile_context>

<pallas_src>
import jax
import jax.numpy as jnp
from jax.experimental import pallas as pl
from jax.experimental.pallas import tpu as pltpu


def _round_up(x, m):
    return ((x + m - 1) // m) * m


def make_causal_conv1d(in_channels, out_channels, kernel_size, dilation, L,
                       compute_dtype=None, l_tile_target=512, co_tile=256):
    pad = (kernel_size - 1) * dilation          # causal left padding
    # Halo width: lane-aligned, >= pad.  (0 when K == 1.)
    H = _round_up(pad, 128) if pad > 0 else 0
    Hmin = max(H, 128)

    # ---- generation-aware VMEM budget -------------------------------------
    try:
        vmem_cap = int(pltpu.get_tpu_info().vmem_capacity_bytes)
    except Exception:
        vmem_cap = 64 << 20                     # v7x physical size: safe floor
    budget = int(vmem_cap * 0.7)

    # ---- tile selection -----------------------------------------------------
    TL = _round_up(min(_round_up(L, 128), max(l_tile_target, 128)), 128)
    if H > 0:
        TL = _round_up(TL, H)   # halo block (width H) needs an integral index

    # Weight small enough -> keep it resident across the whole grid (NCo == 1).
    w_bytes = out_channels * kernel_size * in_channels * 4
    if w_bytes <= (2 << 20) or out_channels <= co_tile:
        TCo = out_channels
    else:
        TCo = co_tile

    def vmem_need(tl, tco):
        eb = 4  # conservative (f32) per-element estimate
        n = 0
        n += 2 * in_channels * tl * eb                         # x tile (dbl buf)
        n += 2 * in_channels * H * eb                          # halo (dbl buf)
        n += 2 * kernel_size * tco * in_channels * eb          # weight
        n += 2 * tco * eb                                      # bias
        n += 2 * tco * tl * eb                                 # output tile
        n += in_channels * (H + tl) * eb                       # window temp
        n += in_channels * tl * eb                             # shifted view
        n += tco * tl * 4                                      # f32 accumulator
        return n

    for _ in range(8):
        if vmem_need(TL, TCo) <= budget:
            break
        if TL > Hmin:
            TL = max(_round_up(TL // 2, Hmin), Hmin)
        elif TCo > 8 and out_channels > 8:
            TCo = max(8, (TCo // 2 // 8) * 8)
        else:
            break

    NL = pl.cdiv(L, TL)
    NCo = pl.cdiv(out_channels, TCo)
    m = (TL // H) if H > 0 else 1

    vmem_limit = int(min(vmem_cap - (8 << 20),
                         max(2 * vmem_need(TL, TCo), 32 << 20)))
    vmem_limit = max(vmem_limit, 16 << 20)

    # ---- kernel -------------------------------------------------------------
    def kernel(*refs):
        if pad > 0:
            xc_ref, xh_ref, w_ref, b_ref, o_ref = refs
        else:
            xc_ref, w_ref, b_ref, o_ref = refs

        cur = xc_ref[0]                                    # (C_in, TL)
        if pad > 0:
            l = pl.program_id(1)
            # At the causal boundary (l == 0) the clamped halo block holds
            # meaningless data -> zero it (scalar-predicated select, cheap).
            halo = jnp.where(l > 0, xh_ref[0], jnp.zeros_like(xh_ref[0]))
            window = jnp.concatenate([halo, cur], axis=-1)  # (C_in, H + TL)

        # K accumulating MXU dots; static (unaligned) lane slices of `window`
        # lower to XLU rotates that overlap the MXU pushes.  No im2col slab.
        acc = None
        for j in range(kernel_size):
            s = (kernel_size - 1 - j) * dilation            # look-back of tap j
            xv = cur if s == 0 else window[:, H - s: H - s + TL]
            part = jnp.dot(w_ref[j], xv, preferred_element_type=jnp.float32)
            acc = part if acc is None else acc + part
        # Columns past L (ragged last tile) read undefined data, but they only
        # feed output columns >= L which are masked on store (no reduction
        # across L, so this is safe).
        o_ref[0] = (acc + b_ref[...]).astype(o_ref.dtype)

    # ---- wrapper ------------------------------------------------------------
    def fwd(x, weight, bias):
        N = x.shape[0]
        out_dtype = x.dtype
        if compute_dtype is not None:
            x = x.astype(compute_dtype)
            weight = weight.astype(compute_dtype)
        # (C_out, C_in, K) -> (K, C_out, C_in): tap-major so the kernel indexes
        # taps along the leading axis (no lane slicing of the weight).
        w3 = jnp.transpose(weight, (2, 0, 1))
        b2 = bias.astype(jnp.float32).reshape(out_channels, 1)

        x_cur_spec = pl.BlockSpec((1, in_channels, TL),
                                  lambda n, l, co: (n, 0, l))
        w_spec = pl.BlockSpec((kernel_size, TCo, in_channels),
                              lambda n, l, co: (0, co, 0))
        b_spec = pl.BlockSpec((TCo, 1), lambda n, l, co: (co, 0))

        if pad > 0:
            # H columns of x just before the current tile (block index clamped
            # at 0; masked in-kernel when l == 0).  Depends only on (n, l), so
            # its DMA is skipped across the innermost C_out loop.
            halo_spec = pl.BlockSpec(
                (1, in_channels, H),
                lambda n, l, co: (n, 0, jnp.maximum(l * m - 1, 0)))
            in_specs = [x_cur_spec, halo_spec, w_spec, b_spec]
            operands = (x, x, w3, b2)
        else:
            in_specs = [x_cur_spec, w_spec, b_spec]
            operands = (x, w3, b2)

        return pl.pallas_call(
            kernel,
            out_shape=jax.ShapeDtypeStruct((N, out_channels, L), out_dtype),
            grid_spec=pltpu.PrefetchScalarGridSpec(
                num_scalar_prefetch=0,
                # C_out innermost: x tile + halo indices are constant across
                # the inner loop -> x streamed from HBM exactly once.
                grid=(N, NL, NCo),
                in_specs=in_specs,
                out_specs=pl.BlockSpec((1, TCo, TL),
                                       lambda n, l, co: (n, co, l)),
            ),
            compiler_params=pltpu.CompilerParams(
                # No reduction axis: every grid point writes a distinct output
                # tile, so all axes are parallel (shards across TCs).
                dimension_semantics=("parallel", "parallel", "parallel"),
                vmem_limit_bytes=vmem_limit),
        )(*operands)

    return fwd


def reference_causal_conv1d(x, weight, bias, dilation):
    # Pure-JAX reference matching nn.Conv1d(padding=(K-1)*d, dilation=d)
    # followed by slicing off the last (K-1)*d outputs.
    K = weight.shape[-1]
    pad = (K - 1) * dilation
    y = jax.lax.conv_general_dilated(
        x, weight,
        window_strides=(1,),
        padding=[(pad, pad)],
        rhs_dilation=(dilation,),
        dimension_numbers=("NCH", "OIH", "NCH"),
    )
    y = y + bias.reshape(1, -1, 1)
    return y[..., :-pad] if pad != 0 else y


if __name__ == "__main__":
    def run_case(N, C_in, C_out, L, K, dilation, l_tile_target=512):
        key = jax.random.PRNGKey(0)
        kx, kw, kb = jax.random.split(key, 3)
        x = jax.random.normal(kx, (N, C_in, L), dtype=jnp.float32)
        # PyTorch-style Conv1d init: U(-sqrt(1/(C_in*K)), +sqrt(1/(C_in*K)))
        bound = 1.0 / (C_in * K) ** 0.5
        weight = jax.random.uniform(kw, (C_out, C_in, K), minval=-bound,
                                    maxval=bound, dtype=jnp.float32)
        bias = jax.random.uniform(kb, (C_out,), minval=-bound, maxval=bound,
                                  dtype=jnp.float32)

        fwd = make_causal_conv1d(C_in, C_out, K, dilation, L,
                                 l_tile_target=l_tile_target)
        y = jax.block_until_ready(fwd(x, weight, bias))
        y_ref = reference_causal_conv1d(x, weight, bias, dilation)
        assert y.shape == (N, C_out, L)
        assert jnp.allclose(y, y_ref, atol=1e-5, rtol=1e-5), \
            "mismatch vs JAX reference"

    # Primary small, module-consistent case (single L tile, causal boundary).
    run_case(N=2, C_in=4, C_out=8, L=16, K=3, dilation=2)
    # Multi-tile case: exercises the l > 0 halo path and the ragged L tail.
    run_case(N=2, C_in=8, C_out=16, L=200, K=3, dilation=4, l_tile_target=128)

    print("KERNEL_OK")
</pallas_src>

<mosaic_0001>
module attributes {stable_mosaic.version = 11 : i64} {
  func.func @kernel(%arg0: i32, %arg1: i32, %arg2: i32, %arg3: memref<1x4x128xf32, #tpu.memory_space<vmem>>, %arg4: memref<1x4x128xf32, #tpu.memory_space<vmem>>, %arg5: memref<3x8x4xf32, #tpu.memory_space<vmem>>, %arg6: memref<8x1xf32, #tpu.memory_space<vmem>>, %arg7: memref<1x8x128xf32, #tpu.memory_space<vmem>>) attributes {dimension_semantics = [#tpu.dimension_semantics<parallel>, #tpu.dimension_semantics<parallel>, #tpu.dimension_semantics<parallel>], iteration_bounds = array<i64: 2, 1, 1>, scalar_prefetch = 0 : i64, scratch_operands = 0 : i64, tpu.core_type = #tpu.core_type<tc>, window_params = [{transform_indices = @transform_0, window_bounds = array<i64: 1, 4, 128>}, {transform_indices = @transform_1, window_bounds = array<i64: 1, 4, 128>}, {transform_indices = @transform_2, window_bounds = array<i64: 3, 8, 4>}, {transform_indices = @transform_3, window_bounds = array<i64: 8, 1>}, {transform_indices = @transform_4, window_bounds = array<i64: 1, 8, 128>}]} {
    %c0 = arith.constant 0 : index
    %c0_0 = arith.constant 0 : index
    %c0_1 = arith.constant 0 : index
    %0 = vector.load %arg3[%c0, %c0_0, %c0_1] : memref<1x4x128xf32, #tpu.memory_space<vmem>>, vector<1x4x128xf32>
    %1 = vector.shape_cast %0 : vector<1x4x128xf32> to vector<4x128xf32>
    %c0_i32 = arith.constant 0 : i32
    %2 = arith.cmpi sgt, %arg1, %c0_i32 : i32
    %c0_2 = arith.constant 0 : index
    %c0_3 = arith.constant 0 : index
    %c0_4 = arith.constant 0 : index
    %3 = vector.load %arg4[%c0_2, %c0_3, %c0_4] : memref<1x4x128xf32, #tpu.memory_space<vmem>>, vector<1x4x128xf32>
    %4 = vector.shape_cast %3 : vector<1x4x128xf32> to vector<4x128xf32>
    %cst = arith.constant 0.000000e+00 : f32
    %5 = vector.broadcast %cst : f32 to vector<4x128xf32>
    %6 = arith.select %2, %4, %5 : vector<4x128xf32>
    %7 = tpu.concatenate %6, %1 in 1 : vector<4x128xf32>, vector<4x128xf32> -> vector<4x256xf32>
    %8 = vector.extract_strided_slice %7 {offsets = [0, 124], sizes = [4, 128], strides = [1, 1]} : vector<4x256xf32> to vector<4x128xf32>
    %c0_5 = arith.constant 0 : index
    %c0_6 = arith.constant 0 : index
    %c0_7 = arith.constant 0 : index
    %9 = vector.load %arg5[%c0_5, %c0_6, %c0_7] : memref<3x8x4xf32, #tpu.memory_space<vmem>>, vector<1x8x4xf32>
    %10 = vector.shape_cast %9 : vector<1x8x4xf32> to vector<8x4xf32>
    %cst_8 = arith.constant dense<0.000000e+00> : vector<8x128xf32>
    %11 = tpu.matmul %10, %8, %cst_8 {dimension_numbers = #tpu.dot_dimension_numbers<[1], [0], [0], [1], [0, 0, 1, 1], [], []>} : vector<8x4xf32>, vector<4x128xf32>, vector<8x128xf32> -> vector<8x128xf32>
    %12 = vector.extract_strided_slice %7 {offsets = [0, 126], sizes = [4, 128], strides = [1, 1]} : vector<4x256xf32> to vector<4x128xf32>
    %c1 = arith.constant 1 : index
    %c0_9 = arith.constant 0 : index
    %c0_10 = arith.constant 0 : index
    %13 = vector.load %arg5[%c1, %c0_9, %c0_10] : memref<3x8x4xf32, #tpu.memory_space<vmem>>, vector<1x8x4xf32>
    %14 = vector.shape_cast %13 : vector<1x8x4xf32> to vector<8x4xf32>
    %cst_11 = arith.constant dense<0.000000e+00> : vector<8x128xf32>
    %15 = tpu.matmul %14, %12, %cst_11 {dimension_numbers = #tpu.dot_dimension_numbers<[1], [0], [0], [1], [0, 0, 1, 1], [], []>} : vector<8x4xf32>, vector<4x128xf32>, vector<8x128xf32> -> vector<8x128xf32>
    %16 = arith.addf %11, %15 : vector<8x128xf32>
    %c2 = arith.constant 2 : index
    %c0_12 = arith.constant 0 : index
    %c0_13 = arith.constant 0 : index
    %17 = vector.load %arg5[%c2, %c0_12, %c0_13] : memref<3x8x4xf32, #tpu.memory_space<vmem>>, vector<1x8x4xf32>
    %18 = vector.shape_cast %17 : vector<1x8x4xf32> to vector<8x4xf32>
    %cst_14 = arith.constant dense<0.000000e+00> : vector<8x128xf32>
    %19 = tpu.matmul %18, %1, %cst_14 {dimension_numbers = #tpu.dot_dimension_numbers<[1], [0], [0], [1], [0, 0, 1, 1], [], []>} : vector<8x4xf32>, vector<4x128xf32>, vector<8x128xf32> -> vector<8x128xf32>
    %20 = arith.addf %16, %19 : vector<8x128xf32>
    %c0_15 = arith.constant 0 : index
    %c0_16 = arith.constant 0 : index
    %21 = vector.load %arg6[%c0_15, %c0_16] : memref<8x1xf32, #tpu.memory_space<vmem>>, vector<8x1xf32>
    %22 = vector.broadcast %21 : vector<8x1xf32> to vector<8x128xf32>
    %23 = arith.addf %20, %22 : vector<8x128xf32>
    %c0_17 = arith.constant 0 : index
    %c0_18 = arith.constant 0 : index
    %c0_19 = arith.constant 0 : index
    %24 = vector.load %arg7[%c0_17, %c0_18, %c0_19] : memref<1x8x128xf32, #tpu.memory_space<vmem>>, vector<1x8x128xf32>
    %25 = vector.shape_cast %24 : vector<1x8x128xf32> to vector<8x128xf32>
    %26 = vector.shape_cast %23 : vector<8x128xf32> to vector<1x8x128xf32>
    tpu.vector_store %arg7[%c0_17, %c0_18, %c0_19], %26 {strides = array<i32>} : memref<1x8x128xf32, #tpu.memory_space<vmem>>, vector<1x8x128xf32>,
    return
  }
  func.func @transform_0(%arg0: i32, %arg1: i32, %arg2: i32) -> (i32, i32, i32) {
    %c0_i32 = arith.constant 0 : i32
    %c0_i32_0 = arith.constant 0 : i32
    return %arg0, %c0_i32, %arg1 : i32, i32, i32
  }
  func.func @transform_1(%arg0: i32, %arg1: i32, %arg2: i32) -> (i32, i32, i32) {
    %c1_i32 = arith.constant 1 : i32
    %0 = arith.muli %arg1, %c1_i32 : i32
    %c1_i32_0 = arith.constant 1 : i32
    %1 = arith.subi %0, %c1_i32_0 : i32
    %c0_i32 = arith.constant 0 : i32
    %2 = arith.maxsi %1, %c0_i32 : i32
    %c0_i32_1 = arith.constant 0 : i32
    %c0_i32_2 = arith.constant 0 : i32
    return %arg0, %c0_i32_1, %2 : i32, i32, i32
  }
  func.func @transform_2(%arg0: i32, %arg1: i32, %arg2: i32) -> (i32, i32, i32) {
    %c0_i32 = arith.constant 0 : i32
    %c0_i32_0 = arith.constant 0 : i32
    %c0_i32_1 = arith.constant 0 : i32
    return %c0_i32, %arg2, %c0_i32_0 : i32, i32, i32
  }
  func.func @transform_3(%arg0: i32, %arg1: i32, %arg2: i32) -> (i32, i32) {
    %c0_i32 = arith.constant 0 : i32
    %c0_i32_0 = arith.constant 0 : i32
    return %arg2, %c0_i32 : i32, i32
  }
  func.func @transform_4(%arg0: i32, %arg1: i32, %arg2: i32) -> (i32, i32, i32) {
    %c0_i32 = arith.constant 0 : i32
    return %arg0, %arg2, %arg1 : i32, i32, i32
  }
}

</mosaic_0001>

<bundles_post_ra>
// kernel: tpu_custom_call.1
= control target key start
LH: loop header
LB: loop body
LE: loop exit
PB: predicated region body
PF: predicated region fallthrough
CT: control target
= control target key end

     0   :  { %9 = vsyncpa [#allocation3], 0  ;;  %s1053_s0 = inlined_call_operand.vmem [shape: f32[2,4,16], index: 0, kind: input, shape index: {}]   ;;  %s1054_s1 = inlined_call_operand.vmem [shape: f32[2,4,16], index: 1, kind: input, shape index: {}]   ;;  %s1055_s2 = inlined_call_operand.vmem [shape: f32[3,8,4], index: 2, kind: input, shape index: {}]   ;;  %s1056_s3 = inlined_call_operand.vmem [shape: f32[8,1], index: 3, kind: input, shape index: {}]   ;;  %s1057_s4 = inlined_call_operand.hbm [shape: f32[2,8,16], index: 4, kind: output, shape index: {}]  }
   0x1   :  { %11 = vsyncpa [#allocation3 + $0x1], 0  ;;  %s922_s15 = smov 0   ;;  %s924_s16 = smov 0  }
   0x2   :  { %s926_s17 = smov 0   ;;  %s928_s18 = smov 0  }
   0x3   :  { %s930_s1 = smov 0   ;;  %s932_s19 = smov 0  }
   0x4 LB: > { %s707_s20 = sadd.s32 4294967295, %s889_s19   ;;  %s708_s21 = sadd.s32 4294967294, %s889_s19   ;;  %s889_s19 = sphi %s932_s19, %s17_s19   ;;  %s885_s1 = sphi %s930_s1, %s1064_s1   ;;  %s881_s18 = sphi %s928_s18, %s1063_s18   ;;  %s877_s17 = sphi %s926_s17, %s1062_s17   ;;  %s873_s16 = sphi %s924_s16, %s1061_s16   ;;  %s869_s15 = sphi %s922_s15, %s1060_s15  }
   0x5   : > { %s36_s22 = sadd.s32 1, %s885_s1  ;;  %s161_s23 = sadd.s32 1, %s877_s17 }
   0x6   : > { %p38_p0 = scmp.ge.s32.totalorder %s36_s22, 2  ;;  %p171_p1 = scmp.ne.s32.totalorder %s877_s17, %s873_s16 }
   0x7   : > { %p172_p2 = scmp.eq.s32.totalorder %s707_s20, 1  ;;  %p177_p3 = scmp.ne.s32.totalorder %s873_s16, %s869_s15 }
   0x8   : > { %s1066_s22 = smov (%p38_p0, %s36_s22), 0  ;;  %p178_p5 = scmp.eq.s32.totalorder %s708_s21, 1 }
   0x9   : > { %p962_p4 = por %p172_p2, %p171_p1  ;;  %s154_s25 = ssub.s32 %s885_s1, %s1066_s22 }
   0xa   : > { %p713_p6 = scmp.ge.s32.totalorder %s889_s19, 1  ;;  %p159_p7 = scmp.eq.s32.totalorder %s154_s25, 0 }
   0xb   : > { %p969_p8 = por %p178_p5, %p177_p3  ;;  %p236_p9 = scmp.lt.s32.totalorder %s889_s19, 3 }
   0xc   : > { %s975_s27 = scalar_select %p159_p7, %s877_s17, %s161_s23  }
   0xd   : > { %p237_p10 = pnand %p713_p6, %p236_p9 }
   0xe   : > { %v891_v0 = vmov (!%p237_p10), 0.0   ;;  %s892_s28 = smov (!%p237_p10), 4   ;;  %s893_s29 = smov (!%p237_p10), 2   ;;  %vm894_vm0 = vmmov (!%p237_p10), 0   ;;  %v895_v1 = vmov (!%p237_p10), 0   ;;  %v563_v3 = vld [vmem:[%s1056_s3] sm:$0xff] (!%p237_p10) }
   0xf   : > { %240 = sbr.rel (%p237_p10) target bundleno = 378 (0x17a), region = 36  ;;  %405 = vrot.lane.b32.xlu1 (!%p237_p10), %v891_v0, %s892_s28  ;;  %322 = vrot.lane.b32.xlu0 (!%p237_p10), %v891_v0, %s893_s29  ;;  %p282_p11 = scmp.lt.s32.totalorder (!%p237_p10), %s881_s18, 1  ;;  %vm326_vm1 = vcmask (!%p237_p10), 15360   ;;  %vm328_vm2 = vcmask (!%p237_p10), 31744   ;;  %vm332_vm3 = vcmask (!%p237_p10), 1043456   ;;  %v717_v8 = vld [vmem:[%s1055_s2 + $0x8] sm:$0xff] (!%p237_p10) }
  0x10   : > { %735 = vmatprep.subr.mxu0 (!%p237_p10), %v891_v0  ;;  %740 = vmatprep.subr.mxu1 (!%p237_p10), %v891_v0  ;;  %v317_v11 = vld [vmem:[%s1055_s2] sm:$0xff] (!%p237_p10)  ;;  %v722_v12 = vld [vmem:[%s1055_s2 + $0x10] sm:$0xff] (!%p237_p10)  ;;  %s279_s23 = sand.u32 (!%p237_p10), 1, %s873_s16  }
  0x11   : > { %737 = vmatprep.mubr.msk.f32.mxu0 (!%p237_p10), %vm894_vm0, %v891_v0  ;;  %742 = vmatprep.mubr.msk.f32.mxu1 (!%p237_p10), %vm894_vm0, %v891_v0  ;;  %s714_s25 = sshll.u32 (!%p237_p10), %s279_s23, 3 }
  0x12   : > { %810 = vset.pattern.permute.xlu0 (!%p237_p10), %v895_v1 }
  0x16   : > { %s283_s30 = scalar_select %p282_p11, %s881_s18, 1 }
  0x18   : > { %s715_s5 = sshll.u32 %s283_s30, 2 }
  0x19   : > { %s288_s8 = scalar_lea.vmem %s1053_s0, %s715_s5 }
  0x1a   : > { %v310_v2 = vld [vmem:[%s288_s8] sm:$0xf]  ;;  %s572_s8 = scalar_lea.sflag [#allocation3], %s279_s23 }
  0x1b   : > { %407 = vrot.lane.b32.xlu1 %v310_v2, %s892_s28  ;;  %324 = vrot.lane.b32.xlu0 %v310_v2, %s893_s29  ;;  %s726_s28 = sshll.u32 %s881_s18, 7  ;;  %s281_s29 = scalar_lea.vmem [#allocation2], %s714_s25 }
  0x1c   : > { %s587_s30 = sshll.u32 %s281_s29, 4  ;;  %s1006_s7 = scalar_lea.hbm %s1057_s4, %s726_s28  ;;  %s1008_s30 = int_to_ptr.vmem [resolvable:$true] %s587_s30 }
  0x1d   : > { %s811_s9 = scalar_lea.vmem %s1008_s30, 128  ;;  %s896_s18 = smov [#allocation2]  }
  0x1e   : > { %p812_p12 = scmp.ne.s32.totalorder %s1008_s30, %s811_s9  ;;  %s815_s10 = sshll.u32 %s896_s18, 4  ;;  %s816_s10 = int_to_ptr.vmem [resolvable:$false] %s815_s10 }
  0x1f   : > { %566 = vperm.xlu0 %810, %v563_v3   ;;  %s817_s11 = scalar_lea.vmem %s816_s10, 256  ;;  %p818_p1 = scmp.lt.s32.totalorder %s1008_s30, %s816_s10 }
  0x20   : > { %p813_p13 = pnand %p812_p12, %p962_p4  ;;  %p819_p2 = scmp.lt.s32.totalorder %s817_s11, %s811_s9 }
  0x22   : > { %p814_p0 = pneg %p813_p13  ;;  %p820_p3 = por %p819_p2, %p818_p1 }
  0x24   : > { %p821_p5 = pnand %p820_p3, %p814_p0 }
  0x81   : > { %v406_v4 = vpop.permute.xlu1 %405  ;;  %v323_v5 = vpop.permute.xlu0 %322 }
  0x8d   : > { %v408_v6 = vpop.permute.xlu1 %407  ;;  %v325_v7 = vpop.permute.xlu0 %324 }
  0x8e   : > { %v327_v9 = vsel %vm326_vm1, %v323_v5, %v325_v7  ;;  %v409_v10 = vsel %vm328_vm2, %v406_v4, %v408_v6 }
  0x8f   : > { %736 = vmatpush3.msk.msra.mxu0 %vm332_vm3, %v327_v9  ;;  %741 = vmatpush3.msk.msra.mxu1 %vm332_vm3, %v409_v10 }
  0x90   : > { %738 = vmatmul.mubr.msk.f32.vlgmr.msra.gmra.mrb[0].mxu0 %vm328_vm2, %v717_v8  ;;  %745 = vmatprep.subr.mxu0 %v891_v0 }
  0x91   : > { %743 = vmatmul.mubr.msk.f32.vlgmr.msra.gmra.mrb[0].mxu1 %vm328_vm2, %v317_v11  ;;  %746 = vmatpush3.msk.msra.mxu0 %vm332_vm3, %v310_v2 }
  0x92   : > { %747 = vmatprep.mubr.msk.f32.mxu0 %vm894_vm0, %v891_v0 }
  0x94   : > { %748 = vmatmul.mubr.msk.f32.vlgmr.msra.gmra.mrb[2].mxu0 %vm328_vm2, %v722_v12 }
  0x9e   : > { %v567_v19 = vpop.permute.xlu0 %566 }
 0x163   : > { %v401_v13 = vpop.f32.mrb[0].mxu0 }
 0x164   : > { %v739_v14 = vpop.f32.mrb[1].mxu0  ;;  %v481_v15 = vpop.f32.mrb[0].mxu1 }
 0x165   : > { %v482_v16 = vadd.f32 %v481_v15, %v401_v13  ;;  %v744_v17 = vpop.f32.mrb[1].mxu1 }
 0x167   : > { %v558_v18 = vpop.f32.mrb[2].mxu0 }
 0x168   : > { %v562_v20 = vadd.f32 %v558_v18, %v482_v16  ;;  %v749_v21 = vpop.f32.mrb[3].mxu0 }
 0x16a   : > { %v569_v22 = vadd.f32 %v567_v19, %v562_v20 }
 0x16c   : > { %570 = vst [vmem:[%s281_s29] sm:$0xff] %v569_v22 }
 0x16d   : > { %824 = shalt.err (!%p821_p5)
}
 0x16e   : > { %s825_s12 = scalar_lea.hbm %s1006_s7, 128  ;;  %s829_s20 = scalar_lea.hbm %s1057_s4, 256 }
 0x16f   : > { %p826_p6 = scmp.ne.s32.totalorder %s1006_s7, %s825_s12  ;;  %p830_p10 = scmp.lt.u32.totalorder %s1006_s7, %s1057_s4 }
 0x170   : > { %p831_p11 = scmp.lt.u32.totalorder %s829_s20, %s825_s12  ;;  %p833_p13 = scmp.lt.u32.totalorder %s825_s12, %s1006_s7 }
 0x171   : > { %p827_p7 = pnand %p826_p6, %p962_p4 }
 0x172   : > { %p832_p12 = por %p831_p11, %p830_p10 }
 0x173   : > { %p828_p9 = pneg %p827_p7 }
 0x174   : > { %p834_p0 = por %p833_p13, %p832_p12 }
 0x176   : > { %p835_p1 = pnand %p834_p0, %p828_p9 }
 0x178   : > { %838 = shalt.err (!%p835_p1)
}
 0x179   : > { %750 = dma.vmem_to_hbm [thread:$0]  (%p962_p4), %s1008_s30, 128, %s1006_s7, %s572_s8  }
 0x17a PF: > { %p756_p2 = scmp.ge.s32.totalorder %s889_s19, 2  ;;  %s599_s25 = sand.u32 1, %s869_s15  }
 0x17b   : > { %s600_s28 = scalar_lea.sflag [#allocation3], %s599_s25 }
 0x17c   : > { %p753_p3 = pnand %p756_p2, %p969_p8 }
 0x17e   : > { %864 = dma.done.wait (!%p753_p3), %s600_s28, 128  }
 0x17f   : > { %866 = vsyncadd (!%p753_p3), %s600_s28, 4294967168  ;;  %s17_s19 = sadd.s32 1, %s889_s19   ;;  %s1060_s15 = smov %s873_s16 }
 0x180   : > { %p14_p5 = scmp.ge.s32.totalorder %s17_s19, 4   ;;  %s1061_s16 = smov %s877_s17 }
 0x181   : > { %s1062_s17 = smov %s975_s27  ;;  %s1063_s18 = smov %s885_s1 }
 0x182   : > { %s1064_s1 = smov %s1066_s22  ;;  %16 = sbr.rel (!%p14_p5) target bundleno = 4 (0x4), region = 82 }
 0x189   :  { %605 = vsyncpa [#allocation3], 1 }
 0x18a   :  { %607 = vsyncpa [#allocation3 + $0x1], 1 }

</bundles_post_ra>
